<compile_context>
chip_gen: v7x
topology: tpu7x:2x2x1
jax: 0.10.0
libtpu: 0.0.40
codegen_flags: <defaults>
</compile_context>

<pallas_src>
import jax
import jax.numpy as jnp
from jax.experimental import pallas as pl
from jax.experimental.pallas import tpu as pltpu


def _sub_decoder_kernel(xT_ref, yT_ref,
                        w1T_ref, b1T_ref, w2T_ref, b2T_ref,
                        w3hT_ref, w3yT_ref, b3T_ref, w4T_ref, b4T_ref,
                        oT_ref):
    # Everything is feature-major: [channels, tile_n] with N on the lane axis.
    xT = xT_ref[...].astype(jnp.float32)
    yT = yT_ref[...].astype(jnp.float32)

    # residual_decoder: MEMLPBlock(in_ch, out_ch//2) -> MEMLPBlock(out_ch//2, out_ch)
    h = jnp.dot(w1T_ref[...], xT, preferred_element_type=jnp.float32)
    h = jnp.maximum(h + b1T_ref[...], 0.0)
    h = jnp.dot(w2T_ref[...], h, preferred_element_type=jnp.float32)
    h = jnp.maximum(h + b2T_ref[...], 0.0)

    # decoder[0] on ME.cat((x_res, y)): concat folded into two dots summed in f32.
    h = (jnp.dot(w3hT_ref[...], h, preferred_element_type=jnp.float32)
         + jnp.dot(w3yT_ref[...], yT, preferred_element_type=jnp.float32))
    h = jnp.maximum(h + b3T_ref[...], 0.0)

    # decoder[1]
    h = jnp.dot(w4T_ref[...], h, preferred_element_type=jnp.float32)
    h = jnp.maximum(h + b4T_ref[...], 0.0)

    oT_ref[...] = h.astype(oT_ref.dtype)


def _round_up(n, m):
    return ((n + m - 1) // m) * m


def _tpu_tuning():
    """(vmem_limit_bytes, min_grid_steps) per TPU generation; safe fallbacks."""
    vmem_limit = 32 * 1024 * 1024
    min_steps = 2
    try:
        kind = jax.devices()[0].device_kind.lower()
    except Exception:
        kind = ""
    if "v7" in kind:
        # 64 MiB physical VMEM per TC, 2 TCs share the "parallel" grid axis.
        vmem_limit = 40 * 1024 * 1024
        min_steps = 4
    elif ("v4" in kind) or ("v5p" in kind):
        # 128 MiB VMEM, 2 TensorCores (megacore).
        vmem_limit = 80 * 1024 * 1024
        min_steps = 4
    elif kind:
        # v5e / v6e: 128 MiB VMEM, single TensorCore -> never split small N.
        vmem_limit = 80 * 1024 * 1024
        min_steps = 1
    return vmem_limit, min_steps


def prepare_params(params, dtype=jnp.float32):
    """One-time layout prep (hoisted out of the per-call path).

    Transposes weights to feature-major, splits W3 at the concat boundary and
    reshapes biases to column vectors. Call once, reuse across forward calls.
    """
    (w1, b1), (w2, b2), (w3, b3), (w4, b4) = params
    out_ch = w4.shape[1]
    w3_h = w3[:out_ch, :]     # multiplies the residual-decoder output
    w3_y = w3[out_ch:, :]     # multiplies y

    def t(w):
        return jnp.asarray(w, dtype).T

    def tb(b):
        return jnp.asarray(b, dtype).reshape(1, -1).T   # -> [C, 1]

    return (t(w1), tb(b1), t(w2), tb(b2),
            t(w3_h), t(w3_y), tb(b3), t(w4), tb(b4))


def sub_decoder_geo_lossl(x, y, prepared, *, tile_n=8192, out_dtype=None):
    """x: [N, in_ch], y: [N, in_ch2] point-major features; returns [N, out_ch]."""
    w1T, b1T, w2T, b2T, w3hT, w3yT, b3T, w4T, b4T = prepared
    N, in_ch = x.shape
    Ny, in_ch2 = y.shape
    assert Ny == N, "x and y must share the coordinate map (same N)"
    out_ch = w4T.shape[0]
    mid_ch = w1T.shape[0]
    out_dtype = x.dtype if out_dtype is None else jnp.dtype(out_dtype)

    vmem_limit, min_steps = _tpu_tuning()

    # Lane tile over N: as large as requested but keep >= min_steps grid steps
    # when N allows it; always a multiple of 128 (lane width).
    cap = max(128, _round_up(-(-N // min_steps), 128))
    tn = max(128, min(_round_up(tile_n, 128), cap))
    grid = (pl.cdiv(N, tn),)   # partial trailing block: OOB writes are masked

    # Feature-major views (N on the lane axis) for lane-dense loads/stores.
    xT = x.T
    yT = y.T
    weight_args = (w1T, b1T, w2T, b2T, w3hT, w3yT, b3T, w4T, b4T)

    flops = 2 * N * (in_ch * mid_ch + mid_ch * out_ch
                     + (out_ch + in_ch2) * out_ch + out_ch * out_ch)
    bytes_accessed = (N * (in_ch + in_ch2) * x.dtype.itemsize
                      + N * out_ch * out_dtype.itemsize
                      + sum(int(w.size) * w.dtype.itemsize for w in weight_args))

    outT = pl.pallas_call(
        _sub_decoder_kernel,
        out_shape=jax.ShapeDtypeStruct((out_ch, N), out_dtype),
        grid_spec=pltpu.PrefetchScalarGridSpec(
            num_scalar_prefetch=0,
            grid=grid,
            in_specs=[
                pl.BlockSpec((in_ch, tn), lambda i: (0, i)),
                pl.BlockSpec((in_ch2, tn), lambda i: (0, i)),
            ] + [pl.BlockSpec(w.shape, lambda i: (0, 0)) for w in weight_args],
            out_specs=pl.BlockSpec((out_ch, tn), lambda i: (0, i)),
        ),
        compiler_params=pltpu.CompilerParams(
            dimension_semantics=("parallel",),
            vmem_limit_bytes=vmem_limit,
        ),
        cost_estimate=pl.CostEstimate(
            flops=flops, transcendentals=0, bytes_accessed=bytes_accessed),
    )(xT, yT, *weight_args)

    return outT.T   # back to point-major [N, out_ch]


def make_params(key, in_ch, in_ch2, out_ch, dtype=jnp.float32):
    """Deterministic synthetic weights matching the module's layer shapes."""
    dims = [
        (in_ch, out_ch // 2),          # residual_decoder[0]
        (out_ch // 2, out_ch),         # residual_decoder[1]
        (out_ch + in_ch2, out_ch),     # decoder[0]
        (out_ch, out_ch),              # decoder[1]
    ]
    params = []
    for d_in, d_out in dims:
        key, kw, kb = jax.random.split(key, 3)
        scale = 1.0 / jnp.sqrt(jnp.asarray(d_in, dtype))
        w = jax.random.uniform(kw, (d_in, d_out), dtype, -scale, scale)
        b = jax.random.uniform(kb, (1, d_out), dtype, -scale, scale)
        params.append((w, b))
    return params


def reference(x, y, params):
    (w1, b1), (w2, b2), (w3, b3), (w4, b4) = params
    h = jnp.maximum(x @ w1 + b1, 0.0)
    h = jnp.maximum(h @ w2 + b2, 0.0)
    c = jnp.concatenate([h, y], axis=-1)
    h = jnp.maximum(c @ w3 + b3, 0.0)
    return jnp.maximum(h @ w4 + b4, 0.0)


if __name__ == "__main__":
    key = jax.random.PRNGKey(0)
    # Small shapes consistent with the module; N deliberately NOT a multiple of
    # 128 so the partial trailing block (masked writes) path is exercised.
    N, in_ch, in_ch2, out_ch = 300, 8, 8, 16

    kx, ky, kp = jax.random.split(key, 3)
    x = jax.random.normal(kx, (N, in_ch), jnp.float32)   # x sparse-tensor features
    y = jax.random.normal(ky, (N, in_ch2), jnp.float32)  # y sparse-tensor features
    params = make_params(kp, in_ch, in_ch2, out_ch)

    prepared = prepare_params(params)                    # one-time layout prep
    out = sub_decoder_geo_lossl(x, y, prepared)
    out = jax.block_until_ready(out)

    ref = reference(x, y, params)
    assert out.shape == (N, out_ch)
    assert jnp.allclose(out, ref, atol=1e-5, rtol=1e-5)
    print("KERNEL_OK")
</pallas_src>

<mosaic_0001>
module attributes {stable_mosaic.version = 11 : i64} {
  func.func @_sub_decoder_kernel(%arg0: i32, %arg1: memref<8x384xf32, #tpu.memory_space<vmem>>, %arg2: memref<8x384xf32, #tpu.memory_space<vmem>>, %arg3: memref<8x8xf32, #tpu.memory_space<vmem>>, %arg4: memref<8x1xf32, #tpu.memory_space<vmem>>, %arg5: memref<16x8xf32, #tpu.memory_space<vmem>>, %arg6: memref<16x1xf32, #tpu.memory_space<vmem>>, %arg7: memref<16x16xf32, #tpu.memory_space<vmem>>, %arg8: memref<16x8xf32, #tpu.memory_space<vmem>>, %arg9: memref<16x1xf32, #tpu.memory_space<vmem>>, %arg10: memref<16x16xf32, #tpu.memory_space<vmem>>, %arg11: memref<16x1xf32, #tpu.memory_space<vmem>>, %arg12: memref<16x384xf32, #tpu.memory_space<vmem>>) attributes {dimension_semantics = [#tpu.dimension_semantics<parallel>], iteration_bounds = array<i64: 1>, scalar_prefetch = 0 : i64, scratch_operands = 0 : i64, tpu.core_type = #tpu.core_type<tc>, window_params = [{transform_indices = @transform_0, window_bounds = array<i64: 8, 384>}, {transform_indices = @transform_1, window_bounds = array<i64: 8, 384>}, {pipeline_mode = #tpu.pipeline_mode<synchronous>, transform_indices = @transform_2, window_bounds = array<i64: 8, 8>}, {pipeline_mode = #tpu.pipeline_mode<synchronous>, transform_indices = @transform_3, window_bounds = array<i64: 8, 1>}, {pipeline_mode = #tpu.pipeline_mode<synchronous>, transform_indices = @transform_4, window_bounds = array<i64: 16, 8>}, {pipeline_mode = #tpu.pipeline_mode<synchronous>, transform_indices = @transform_5, window_bounds = array<i64: 16, 1>}, {pipeline_mode = #tpu.pipeline_mode<synchronous>, transform_indices = @transform_6, window_bounds = array<i64: 16, 16>}, {pipeline_mode = #tpu.pipeline_mode<synchronous>, transform_indices = @transform_7, window_bounds = array<i64: 16, 8>}, {pipeline_mode = #tpu.pipeline_mode<synchronous>, transform_indices = @transform_8, window_bounds = array<i64: 16, 1>}, {pipeline_mode = #tpu.pipeline_mode<synchronous>, transform_indices = @transform_9, window_bounds = array<i64: 16, 16>}, {pipeline_mode = #tpu.pipeline_mode<synchronous>, transform_indices = @transform_10, window_bounds = array<i64: 16, 1>}, {transform_indices = @transform_11, window_bounds = array<i64: 16, 384>}]} {
    %c0 = arith.constant 0 : index
    %c0_0 = arith.constant 0 : index
    %0 = vector.load %arg1[%c0, %c0_0] : memref<8x384xf32, #tpu.memory_space<vmem>>, vector<8x384xf32>
    %c0_1 = arith.constant 0 : index
    %c0_2 = arith.constant 0 : index
    %1 = vector.load %arg2[%c0_1, %c0_2] : memref<8x384xf32, #tpu.memory_space<vmem>>, vector<8x384xf32>
    %c0_3 = arith.constant 0 : index
    %c0_4 = arith.constant 0 : index
    %2 = vector.load %arg3[%c0_3, %c0_4] : memref<8x8xf32, #tpu.memory_space<vmem>>, vector<8x8xf32>
    %cst = arith.constant dense<0.000000e+00> : vector<8x384xf32>
    %3 = tpu.matmul %2, %0, %cst {dimension_numbers = #tpu.dot_dimension_numbers<[1], [0], [0], [1], [0, 0, 1, 1], [], []>} : vector<8x8xf32>, vector<8x384xf32>, vector<8x384xf32> -> vector<8x384xf32>
    %c0_5 = arith.constant 0 : index
    %c0_6 = arith.constant 0 : index
    %4 = vector.load %arg4[%c0_5, %c0_6] : memref<8x1xf32, #tpu.memory_space<vmem>>, vector<8x1xf32>
    %5 = vector.broadcast %4 : vector<8x1xf32> to vector<8x384xf32>
    %6 = arith.addf %3, %5 : vector<8x384xf32>
    %cst_7 = arith.constant 0.000000e+00 : f32
    %7 = vector.broadcast %cst_7 : f32 to vector<8x384xf32>
    %8 = arith.maximumf %6, %7 : vector<8x384xf32>
    %c0_8 = arith.constant 0 : index
    %c0_9 = arith.constant 0 : index
    %9 = vector.load %arg5[%c0_8, %c0_9] : memref<16x8xf32, #tpu.memory_space<vmem>>, vector<16x8xf32>
    %cst_10 = arith.constant dense<0.000000e+00> : vector<16x384xf32>
    %10 = tpu.matmul %9, %8, %cst_10 {dimension_numbers = #tpu.dot_dimension_numbers<[1], [0], [0], [1], [0, 0, 1, 1], [], []>} : vector<16x8xf32>, vector<8x384xf32>, vector<16x384xf32> -> vector<16x384xf32>
    %c0_11 = arith.constant 0 : index
    %c0_12 = arith.constant 0 : index
    %11 = vector.load %arg6[%c0_11, %c0_12] : memref<16x1xf32, #tpu.memory_space<vmem>>, vector<16x1xf32>
    %12 = vector.broadcast %11 : vector<16x1xf32> to vector<16x384xf32>
    %13 = arith.addf %10, %12 : vector<16x384xf32>
    %cst_13 = arith.constant 0.000000e+00 : f32
    %14 = vector.broadcast %cst_13 : f32 to vector<16x384xf32>
    %15 = arith.maximumf %13, %14 : vector<16x384xf32>
    %c0_14 = arith.constant 0 : index
    %c0_15 = arith.constant 0 : index
    %16 = vector.load %arg7[%c0_14, %c0_15] : memref<16x16xf32, #tpu.memory_space<vmem>>, vector<16x16xf32>
    %cst_16 = arith.constant dense<0.000000e+00> : vector<16x384xf32>
    %17 = tpu.matmul %16, %15, %cst_16 {dimension_numbers = #tpu.dot_dimension_numbers<[1], [0], [0], [1], [0, 0, 1, 1], [], []>} : vector<16x16xf32>, vector<16x384xf32>, vector<16x384xf32> -> vector<16x384xf32>
    %c0_17 = arith.constant 0 : index
    %c0_18 = arith.constant 0 : index
    %18 = vector.load %arg8[%c0_17, %c0_18] : memref<16x8xf32, #tpu.memory_space<vmem>>, vector<16x8xf32>
    %cst_19 = arith.constant dense<0.000000e+00> : vector<16x384xf32>
    %19 = tpu.matmul %18, %1, %cst_19 {dimension_numbers = #tpu.dot_dimension_numbers<[1], [0], [0], [1], [0, 0, 1, 1], [], []>} : vector<16x8xf32>, vector<8x384xf32>, vector<16x384xf32> -> vector<16x384xf32>
    %20 = arith.addf %17, %19 : vector<16x384xf32>
    %c0_20 = arith.constant 0 : index
    %c0_21 = arith.constant 0 : index
    %21 = vector.load %arg9[%c0_20, %c0_21] : memref<16x1xf32, #tpu.memory_space<vmem>>, vector<16x1xf32>
    %22 = vector.broadcast %21 : vector<16x1xf32> to vector<16x384xf32>
    %23 = arith.addf %20, %22 : vector<16x384xf32>
    %cst_22 = arith.constant 0.000000e+00 : f32
    %24 = vector.broadcast %cst_22 : f32 to vector<16x384xf32>
    %25 = arith.maximumf %23, %24 : vector<16x384xf32>
    %c0_23 = arith.constant 0 : index
    %c0_24 = arith.constant 0 : index
    %26 = vector.load %arg10[%c0_23, %c0_24] : memref<16x16xf32, #tpu.memory_space<vmem>>, vector<16x16xf32>
    %cst_25 = arith.constant dense<0.000000e+00> : vector<16x384xf32>
    %27 = tpu.matmul %26, %25, %cst_25 {dimension_numbers = #tpu.dot_dimension_numbers<[1], [0], [0], [1], [0, 0, 1, 1], [], []>} : vector<16x16xf32>, vector<16x384xf32>, vector<16x384xf32> -> vector<16x384xf32>
    %c0_26 = arith.constant 0 : index
    %c0_27 = arith.constant 0 : index
    %28 = vector.load %arg11[%c0_26, %c0_27] : memref<16x1xf32, #tpu.memory_space<vmem>>, vector<16x1xf32>
    %29 = vector.broadcast %28 : vector<16x1xf32> to vector<16x384xf32>
    %30 = arith.addf %27, %29 : vector<16x384xf32>
    %cst_28 = arith.constant 0.000000e+00 : f32
    %31 = vector.broadcast %cst_28 : f32 to vector<16x384xf32>
    %32 = arith.maximumf %30, %31 : vector<16x384xf32>
    %c0_29 = arith.constant 0 : index
    %c0_30 = arith.constant 0 : index
    %33 = vector.load %arg12[%c0_29, %c0_30] : memref<16x384xf32, #tpu.memory_space<vmem>>, vector<16x384xf32>
    tpu.vector_store %arg12[%c0_29, %c0_30], %32 {strides = array<i32>} : memref<16x384xf32, #tpu.memory_space<vmem>>, vector<16x384xf32>,
    return
  }
  func.func @transform_0(%arg0: i32) -> (i32, i32) {
    %c0_i32 = arith.constant 0 : i32
    %c0_i32_0 = arith.constant 0 : i32
    return %c0_i32, %arg0 : i32, i32
  }
  func.func @transform_1(%arg0: i32) -> (i32, i32) {
    %c0_i32 = arith.constant 0 : i32
    %c0_i32_0 = arith.constant 0 : i32
    return %c0_i32, %arg0 : i32, i32
  }
  func.func @transform_2(%arg0: i32) -> (i32, i32) {
    %c0_i32 = arith.constant 0 : i32
    %c0_i32_0 = arith.constant 0 : i32
    %c0_i32_1 = arith.constant 0 : i32
    return %c0_i32, %c0_i32_0 : i32, i32
  }
  func.func @transform_3(%arg0: i32) -> (i32, i32) {
    %c0_i32 = arith.constant 0 : i32
    %c0_i32_0 = arith.constant 0 : i32
    %c0_i32_1 = arith.constant 0 : i32
    return %c0_i32, %c0_i32_0 : i32, i32
  }
  func.func @transform_4(%arg0: i32) -> (i32, i32) {
    %c0_i32 = arith.constant 0 : i32
    %c0_i32_0 = arith.constant 0 : i32
    %c0_i32_1 = arith.constant 0 : i32
    return %c0_i32, %c0_i32_0 : i32, i32
  }
  func.func @transform_5(%arg0: i32) -> (i32, i32) {
    %c0_i32 = arith.constant 0 : i32
    %c0_i32_0 = arith.constant 0 : i32
    %c0_i32_1 = arith.constant 0 : i32
    return %c0_i32, %c0_i32_0 : i32, i32
  }
  func.func @transform_6(%arg0: i32) -> (i32, i32) {
    %c0_i32 = arith.constant 0 : i32
    %c0_i32_0 = arith.constant 0 : i32
    %c0_i32_1 = arith.constant 0 : i32
    return %c0_i32, %c0_i32_0 : i32, i32
  }
  func.func @transform_7(%arg0: i32) -> (i32, i32) {
    %c0_i32 = arith.constant 0 : i32
    %c0_i32_0 = arith.constant 0 : i32
    %c0_i32_1 = arith.constant 0 : i32
    return %c0_i32, %c0_i32_0 : i32, i32
  }
  func.func @transform_8(%arg0: i32) -> (i32, i32) {
    %c0_i32 = arith.constant 0 : i32
    %c0_i32_0 = arith.constant 0 : i32
    %c0_i32_1 = arith.constant 0 : i32
    return %c0_i32, %c0_i32_0 : i32, i32
  }
  func.func @transform_9(%arg0: i32) -> (i32, i32) {
    %c0_i32 = arith.constant 0 : i32
    %c0_i32_0 = arith.constant 0 : i32
    %c0_i32_1 = arith.constant 0 : i32
    return %c0_i32, %c0_i32_0 : i32, i32
  }
  func.func @transform_10(%arg0: i32) -> (i32, i32) {
    %c0_i32 = arith.constant 0 : i32
    %c0_i32_0 = arith.constant 0 : i32
    %c0_i32_1 = arith.constant 0 : i32
    return %c0_i32, %c0_i32_0 : i32, i32
  }
  func.func @transform_11(%arg0: i32) -> (i32, i32) {
    %c0_i32 = arith.constant 0 : i32
    %c0_i32_0 = arith.constant 0 : i32
    return %c0_i32, %arg0 : i32, i32
  }
}

</mosaic_0001>

<bundles_post_ra>
// kernel: tpu_custom_call.1
= control target key start
LH: loop header
LB: loop body
LE: loop exit
PB: predicated region body
PF: predicated region fallthrough
CT: control target
= control target key end

     0   :  { %16 = vsyncpa [#allocation3], 0  ;;  %s1748_s0 = inlined_call_operand.hbm [shape: f32[8,300], index: 0, kind: input, shape index: {}]   ;;  %s1749_s1 = inlined_call_operand.hbm [shape: f32[8,300], index: 1, kind: input, shape index: {}]   ;;  %s1750_s2 = inlined_call_operand.hbm [shape: f32[8,8], index: 2, kind: input, shape index: {}]   ;;  %s1751_s3 = inlined_call_operand.hbm [shape: f32[8,1], index: 3, kind: input, shape index: {}]   ;;  %s1752_s4 = inlined_call_operand.hbm [shape: f32[16,8], index: 4, kind: input, shape index: {}]   ;;  %s1753_s5 = inlined_call_operand.hbm [shape: f32[16,1], index: 5, kind: input, shape index: {}]   ;;  %s1754_s6 = inlined_call_operand.hbm [shape: f32[16,16], index: 6, kind: input, shape index: {}]   ;;  %s1755_s7 = inlined_call_operand.hbm [shape: f32[16,8], index: 7, kind: input, shape index: {}]   ;;  %s1756_s8 = inlined_call_operand.hbm [shape: f32[16,1], index: 8, kind: input, shape index: {}]   ;;  %s1757_s9 = inlined_call_operand.hbm [shape: f32[16,16], index: 9, kind: input, shape index: {}]   ;;  %s1758_s10 = inlined_call_operand.hbm [shape: f32[16,1], index: 10, kind: input, shape index: {}]   ;;  %s1759_s11 = inlined_call_operand.hbm [shape: f32[16,300], index: 11, kind: output, shape index: {}]  }
   0x1   :  { %17 = vsyncpa [#allocation6], 0 }
   0x2   :  { %18 = vsyncpa [#allocation9], 0 }
   0x3   :  { %19 = vsyncpa [#allocation12], 0 }
   0x4   :  { %20 = vsyncpa [#allocation15], 0 }
   0x5   :  { %21 = vsyncpa [#allocation18], 0 }
   0x6   :  { %22 = vsyncpa [#allocation4], 0  ;;  %s1454_s17 = smov [#allocation5]   ;;  %s1455_s19 = smov [#allocation8]  }
   0x7   :  { %s39_s18 = sshll.u32 %s1454_s17, 4  ;;  %s59_s20 = sshll.u32 %s1455_s19, 4  ;;  %s40_s18 = int_to_ptr.vmem [resolvable:$true] %s39_s18  ;;  %s60_s20 = int_to_ptr.vmem [resolvable:$true] %s59_s20 }
   0x8   :  { %s1176_s23 = scalar_lea.hbm %s1749_s1, 384 }
   0x9   :  { %p1177_p0 = scmp.ne.s32.totalorder %s1749_s1, %s1176_s23  ;;  %p1180_p1 = scmp.lt.u32.totalorder %s1176_s23, %s1749_s1 }
   0xb   :  { %p1182_p2 = pnand %p1180_p1, %p1177_p0 }
   0xd   :  { %1185 = shalt.err (!%p1182_p2)
}
   0xe   :  { %s1186_s28 = scalar_lea.vmem %s40_s18, 384  ;;  %p1191_p4 = scmp.lt.s32.totalorder %s40_s18, %s40_s18 }
   0xf   :  { %p1187_p3 = scmp.ne.s32.totalorder %s40_s18, %s1186_s28  ;;  %p1192_p5 = scmp.lt.s32.totalorder %s1186_s28, %s1186_s28 }
  0x11   :  { %p1193_p6 = por %p1192_p5, %p1191_p4 }
  0x13   :  { %p1194_p7 = pnand %p1193_p6, %p1187_p3 }
  0x15   :  { %1197 = shalt.err (!%p1194_p7)
}
  0x16   :  { %42 = dma.hbm_to_vmem [thread:$0]  %s1749_s1, 384, %s40_s18, [#allocation6]  }
  0x17   :  { %s1198_s14 = scalar_lea.hbm %s1751_s3, 128 }
  0x18   :  { %p1199_p8 = scmp.ne.s32.totalorder %s1751_s3, %s1198_s14  ;;  %p1202_p9 = scmp.lt.u32.totalorder %s1198_s14, %s1751_s3 }
  0x1a   :  { %p1204_p10 = pnand %p1202_p9, %p1199_p8 }
  0x1c   :  { %1207 = shalt.err (!%p1204_p10)
}
  0x1d   :  { %s1208_s21 = scalar_lea.vmem %s60_s20, 128  ;;  %p1213_p12 = scmp.lt.s32.totalorder %s60_s20, %s60_s20 }
  0x1e   :  { %p1209_p11 = scmp.ne.s32.totalorder %s60_s20, %s1208_s21  ;;  %p1214_p13 = scmp.lt.s32.totalorder %s1208_s21, %s1208_s21 }
  0x20   :  { %p1215_p0 = por %p1214_p13, %p1213_p12 }
  0x22   :  { %p1216_p1 = pnand %p1215_p0, %p1209_p11 }
  0x24   :  { %1219 = shalt.err (!%p1216_p1)
}
  0x25   :  { %62 = dma.hbm_to_vmem [thread:$0]  %s1751_s3, 128, %s60_s20, [#allocation9]  }
  0x26   :  { %s1456_s22 = smov [#allocation11]   ;;  %s1457_s24 = smov [#allocation14]  }
  0x27   :  { %s80_s23 = sshll.u32 %s1456_s22, 4  ;;  %s104_s25 = sshll.u32 %s1457_s24, 4  ;;  %s81_s23 = int_to_ptr.vmem [resolvable:$true] %s80_s23  ;;  %s1557_s25 = int_to_ptr.vmem [resolvable:$true] %s104_s25 }
  0x28   :  { %s1220_s28 = scalar_lea.hbm %s1753_s5, 256 }
  0x29   :  { %p1221_p2 = scmp.ne.s32.totalorder %s1753_s5, %s1220_s28  ;;  %p1224_p3 = scmp.lt.u32.totalorder %s1220_s28, %s1753_s5 }
  0x2b   :  { %p1226_p4 = pnand %p1224_p3, %p1221_p2 }
  0x2d   :  { %1229 = shalt.err (!%p1226_p4)
}
  0x2e   :  { %s1230_s3 = scalar_lea.vmem %s81_s23, 256  ;;  %p1235_p6 = scmp.lt.s32.totalorder %s81_s23, %s81_s23 }
  0x2f   :  { %p1231_p5 = scmp.ne.s32.totalorder %s81_s23, %s1230_s3  ;;  %p1236_p7 = scmp.lt.s32.totalorder %s1230_s3, %s1230_s3 }
  0x31   :  { %p1237_p8 = por %p1236_p7, %p1235_p6 }
  0x33   :  { %p1238_p9 = pnand %p1237_p8, %p1231_p5 }
  0x35   :  { %1241 = shalt.err (!%p1238_p9)
}
  0x36   :  { %s1458_s20 = smov 128   ;;  %s1459_s14 = smov 8  }
  0x37   :  { %86 = dma.hbm_to_vmem [thread:$0]  %s1753_s5, 256, %s81_s23, [#allocation12], %s1458_s20, %s1458_s20, %s1459_s14  }
  0x38   :  { %s1242_s21 = scalar_lea.hbm %s1755_s7, 256 }
  0x39   :  { %p1243_p10 = scmp.ne.s32.totalorder %s1755_s7, %s1242_s21  ;;  %p1246_p11 = scmp.lt.u32.totalorder %s1242_s21, %s1755_s7 }
  0x3b   :  { %p1248_p12 = pnand %p1246_p11, %p1243_p10 }
  0x3d   :  { %1251 = shalt.err (!%p1248_p12)
}
  0x3e   :  { %s1252_s26 = scalar_lea.vmem %s1557_s25, 256  ;;  %p1257_p0 = scmp.lt.s32.totalorder %s1557_s25, %s1557_s25 }
  0x3f   :  { %p1253_p13 = scmp.ne.s32.totalorder %s1557_s25, %s1252_s26  ;;  %p1258_p1 = scmp.lt.s32.totalorder %s1252_s26, %s1252_s26 }
  0x41   :  { %p1259_p2 = por %p1258_p1, %p1257_p0 }
  0x43   :  { %p1260_p3 = pnand %p1259_p2, %p1253_p13 }
  0x45   :  { %1263 = shalt.err (!%p1260_p3)
}
  0x46   :  { %110 = dma.hbm_to_vmem [thread:$0]  %s1755_s7, 256, %s1557_s25, [#allocation15], %s1458_s20, %s1458_s20, %s1459_s14  }
  0x47   :  { %s1460_s27 = smov [#allocation17]   ;;  %s1461_s29 = smov [#allocation2]  }
  0x48   :  { %s128_s28 = sshll.u32 %s1460_s27, 4  ;;  %s29_s30 = sshll.u32 %s1461_s29, 4  ;;  %s129_s28 = int_to_ptr.vmem [resolvable:$true] %s128_s28  ;;  %s30_s30 = int_to_ptr.vmem [resolvable:$true] %s29_s30 }
  0x49   :  { %s1264_s3 = scalar_lea.hbm %s1757_s9, 256 }
  0x4a   :  { %p1265_p4 = scmp.ne.s32.totalorder %s1757_s9, %s1264_s3  ;;  %p1268_p5 = scmp.lt.u32.totalorder %s1264_s3, %s1757_s9 }
  0x4c   :  { %p1270_p6 = pnand %p1268_p5, %p1265_p4 }
  0x4e   :  { %1273 = shalt.err (!%p1270_p6)
}
  0x4f   :  { %s1274_s7 = scalar_lea.vmem %s129_s28, 256  ;;  %p1279_p8 = scmp.lt.s32.totalorder %s129_s28, %s129_s28 }
  0x50   :  { %p1275_p7 = scmp.ne.s32.totalorder %s129_s28, %s1274_s7  ;;  %p1280_p9 = scmp.lt.s32.totalorder %s1274_s7, %s1274_s7 }
  0x52   :  { %p1281_p10 = por %p1280_p9, %p1279_p8 }
  0x54   :  { %p1282_p11 = pnand %p1281_p10, %p1275_p7 }
  0x56   :  { %1285 = shalt.err (!%p1282_p11)
}
  0x57   :  { %134 = dma.hbm_to_vmem [thread:$0]  %s1757_s9, 256, %s129_s28, [#allocation18], %s1458_s20, %s1458_s20, %s1459_s14  }
  0x58   :  { %s1286_s22 = scalar_lea.hbm %s1748_s0, 384 }
  0x59   :  { %p1287_p12 = scmp.ne.s32.totalorder %s1748_s0, %s1286_s22  ;;  %p1290_p13 = scmp.lt.u32.totalorder %s1286_s22, %s1748_s0 }
  0x5b   :  { %p1292_p0 = pnand %p1290_p13, %p1287_p12 }
  0x5d   :  { %1295 = shalt.err (!%p1292_p0)
}
  0x5e   :  { %s1296_s27 = scalar_lea.vmem %s30_s30, 384  ;;  %p1301_p2 = scmp.lt.s32.totalorder %s30_s30, %s30_s30 }
  0x5f   :  { %p1297_p1 = scmp.ne.s32.totalorder %s30_s30, %s1296_s27  ;;  %p1302_p3 = scmp.lt.s32.totalorder %s1296_s27, %s1296_s27 }
  0x61   :  { %p1303_p4 = por %p1302_p3, %p1301_p2 }
  0x63   :  { %p1304_p5 = pnand %p1303_p4, %p1297_p1 }
  0x65   :  { %1307 = shalt.err (!%p1304_p5)
}
  0x66   :  { %32 = dma.hbm_to_vmem [thread:$0]  %s1748_s0, 384, %s30_s30, [#allocation3]  }
  0x67   :  { %s1462_s29 = smov [#allocation7]   ;;  %s1463_s13 = smov [#allocation10]  }
  0x68   :  { %s49_s12 = sshll.u32 %s1462_s29, 4  ;;  %s68_s3 = sshll.u32 %s1463_s13, 4  ;;  %s50_s12 = int_to_ptr.vmem [resolvable:$true] %s49_s12  ;;  %s1621_s3 = int_to_ptr.vmem [resolvable:$true] %s68_s3 }
  0x69   :  { %s1308_s17 = scalar_lea.hbm %s1750_s2, 128 }
  0x6a   :  { %p1309_p6 = scmp.ne.s32.totalorder %s1750_s2, %s1308_s17  ;;  %p1312_p7 = scmp.lt.u32.totalorder %s1308_s17, %s1750_s2 }
  0x6c   :  { %p1314_p8 = pnand %p1312_p7, %p1309_p6 }
  0x6e   :  { %1317 = shalt.err (!%p1314_p8)
}
  0x6f   :  { %s1318_s0 = scalar_lea.vmem %s50_s12, 128  ;;  %p1323_p10 = scmp.lt.s32.totalorder %s50_s12, %s50_s12 }
  0x70   :  { %p1319_p9 = scmp.ne.s32.totalorder %s50_s12, %s1318_s0  ;;  %p1324_p11 = scmp.lt.s32.totalorder %s1318_s0, %s1318_s0 }
  0x72   :  { %p1325_p12 = por %p1324_p11, %p1323_p10 }
  0x74   :  { %p1326_p13 = pnand %p1325_p12, %p1319_p9 }
  0x76   :  { %1329 = shalt.err (!%p1326_p13)
}
  0x77   :  { %52 = dma.hbm_to_vmem [thread:$0]  %s1750_s2, 128, %s50_s12, [#allocation6]  }
  0x78   :  { %s1330_s24 = scalar_lea.hbm %s1752_s4, 256 }
  0x79   :  { %p1331_p0 = scmp.ne.s32.totalorder %s1752_s4, %s1330_s24  ;;  %p1334_p1 = scmp.lt.u32.totalorder %s1330_s24, %s1752_s4 }
  0x7b   :  { %p1336_p2 = pnand %p1334_p1, %p1331_p0 }
  0x7d   :  { %1339 = shalt.err (!%p1336_p2)
}
  0x7e   :  { %s1340_s9 = scalar_lea.vmem %s1621_s3, 256  ;;  %p1345_p4 = scmp.lt.s32.totalorder %s1621_s3, %s1621_s3 }
  0x7f   :  { %p1341_p3 = scmp.ne.s32.totalorder %s1621_s3, %s1340_s9  ;;  %p1346_p5 = scmp.lt.s32.totalorder %s1340_s9, %s1340_s9 }
  0x81   :  { %p1347_p6 = por %p1346_p5, %p1345_p4 }
  0x83   :  { %p1348_p7 = pnand %p1347_p6, %p1341_p3 }
  0x85   :  { %1351 = shalt.err (!%p1348_p7)
}
  0x86   :  { %74 = dma.hbm_to_vmem [thread:$0]  %s1752_s4, 256, %s1621_s3, [#allocation9], %s1458_s20, %s1458_s20, %s1459_s14  }
  0x87   :  { %s1464_s29 = smov [#allocation13]   ;;  %s1465_s13 = smov [#allocation16]  }
  0x88   :  { %s92_s12 = sshll.u32 %s1464_s29, 4  ;;  %s116_s15 = sshll.u32 %s1465_s13, 4  ;;  %s93_s12 = int_to_ptr.vmem [resolvable:$true] %s92_s12  ;;  %s1655_s15 = int_to_ptr.vmem [resolvable:$true] %s116_s15 }
  0x89   :  { %s1352_s19 = scalar_lea.hbm %s1754_s6, 256 }
  0x8a   :  { %p1353_p8 = scmp.ne.s32.totalorder %s1754_s6, %s1352_s19  ;;  %p1356_p9 = scmp.lt.u32.totalorder %s1352_s19, %s1754_s6 }
  0x8c   :  { %p1358_p10 = pnand %p1356_p9, %p1353_p8 }
  0x8e   :  { %1361 = shalt.err (!%p1358_p10)
}
  0x8f   :  { %s1362_s4 = scalar_lea.vmem %s93_s12, 256  ;;  %p1367_p12 = scmp.lt.s32.totalorder %s93_s12, %s93_s12 }
  0x90   :  { %p1363_p11 = scmp.ne.s32.totalorder %s93_s12, %s1362_s4  ;;  %p1368_p13 = scmp.lt.s32.totalorder %s1362_s4, %s1362_s4 }
  0x92   :  { %p1369_p0 = por %p1368_p13, %p1367_p12 }
  0x94   :  { %p1370_p1 = pnand %p1369_p0, %p1363_p11 }
  0x96   :  { %1373 = shalt.err (!%p1370_p1)
}
  0x97   :  { %98 = dma.hbm_to_vmem [thread:$0]  %s1754_s6, 256, %s93_s12, [#allocation12], %s1458_s20, %s1458_s20, %s1459_s14  }
  0x98   :  { %s1374_s22 = scalar_lea.hbm %s1756_s8, 256 }
  0x99   :  { %p1375_p2 = scmp.ne.s32.totalorder %s1756_s8, %s1374_s22  ;;  %p1378_p3 = scmp.lt.u32.totalorder %s1374_s22, %s1756_s8 }
  0x9b   :  { %p1380_p4 = pnand %p1378_p3, %p1375_p2 }
  0x9d   :  { %1383 = shalt.err (!%p1380_p4)
}
  0x9e   :  { %s1384_s27 = scalar_lea.vmem %s1655_s15, 256  ;;  %p1389_p6 = scmp.lt.s32.totalorder %s1655_s15, %s1655_s15 }
  0x9f   :  { %p1385_p5 = scmp.ne.s32.totalorder %s1655_s15, %s1384_s27  ;;  %p1390_p7 = scmp.lt.s32.totalorder %s1384_s27, %s1384_s27 }
  0xa1   :  { %p1391_p8 = por %p1390_p7, %p1389_p6 }
  0xa3   :  { %p1392_p9 = pnand %p1391_p8, %p1385_p5 }
  0xa5   :  { %1395 = shalt.err (!%p1392_p9)
}
  0xa6   :  { %122 = dma.hbm_to_vmem [thread:$0]  %s1756_s8, 256, %s1655_s15, [#allocation15], %s1458_s20, %s1458_s20, %s1459_s14  }
  0xa7   :  { %s1466_s2 = smov [#allocation19]   ;;  %s1396_s13 = scalar_lea.hbm %s1758_s10, 256 }
  0xa8   :  { %s140_s28 = sshll.u32 %s1466_s2, 4  ;;  %p1397_p10 = scmp.ne.s32.totalorder %s1758_s10, %s1396_s13  ;;  %s141_s28 = int_to_ptr.vmem [resolvable:$true] %s140_s28 }
  0xa9   :  { %p1400_p11 = scmp.lt.u32.totalorder %s1396_s13, %s1758_s10 }
  0xab   :  { %p1402_p12 = pnand %p1400_p11, %p1397_p10 }
  0xad   :  { %1405 = shalt.err (!%p1402_p12)
}
  0xae   :  { %s1406_s25 = scalar_lea.vmem %s141_s28, 256  ;;  %p1411_p0 = scmp.lt.s32.totalorder %s141_s28, %s141_s28 }
  0xaf   :  { %p1407_p13 = scmp.ne.s32.totalorder %s141_s28, %s1406_s25  ;;  %p1412_p1 = scmp.lt.s32.totalorder %s1406_s25, %s1406_s25 }
  0xb1   :  { %p1413_p2 = por %p1412_p1, %p1411_p0 }
  0xb3   :  { %p1414_p3 = pnand %p1413_p2, %p1407_p13 }
  0xb5   :  { %1417 = shalt.err (!%p1414_p3)
}
  0xb6   :  { %146 = dma.hbm_to_vmem [thread:$0]  %s1758_s10, 256, %s141_s28, [#allocation18], %s1458_s20, %s1458_s20, %s1459_s14  }
  0xb7   :  { %1440 = dma.done.wait [#allocation3], 384  }
  0xb8   :  { %1441 = vsyncadd [#allocation3], 4294966912 }
  0xb9   :  { %1442 = dma.done.wait [#allocation6], 512  }
  0xba   :  { %1443 = vsyncadd [#allocation6], 4294966784 }
  0xbb   :  { %1444 = dma.done.wait [#allocation9], 384  }
  0xbc   :  { %1445 = vsyncadd [#allocation9], 4294966912 }
  0xbd   :  { %1446 = dma.done.wait [#allocation12], 512  }
  0xbe   :  { %1447 = vsyncadd [#allocation12], 4294966784 }
  0xbf   :  { %1448 = dma.done.wait [#allocation15], 512  }
  0xc0   :  { %1449 = vsyncadd [#allocation15], 4294966784 }
  0xc1   :  { %1450 = dma.done.wait [#allocation18], 512  }
  0xc2   :  { %1451 = vsyncadd [#allocation18], 4294966784  ;;  %v1467_v0 = vmov 0.0   ;;  %vm1468_vm0 = vmmov 0   ;;  %v1469_v1 = vmov 0   ;;  %vm193_vm1 = vcmask 64512  }
  0xc3   :  { %1104 = vmatprep.subr.mxu1 %v1467_v0  ;;  %1106 = vmatprep.mubr.msk.f32.mxu1 %vm1468_vm0, %v1467_v0  ;;  %v181_v2 = vld [vmem:[#allocation2 + $0x8] sm:$0xff]  ;;  %v182_v3 = vld [vmem:[#allocation2 + $0x10] sm:$0xff]  ;;  %v180_v4 = vld [vmem:[#allocation2] sm:$0xff]  ;;  %vm681_vm2 = vcmask 130048   ;;  %s1470_s10 = smov [#allocation20]  }
  0xc4   :  { %261 = vmatprep.mubr.f32.mxu0 %v1467_v0  ;;  %1174 = vset.pattern.permute.xlu0 %v1469_v1  ;;  %v186_v5 = vld [vmem:[#allocation7] sm:$0xff]  ;;  %v187_v6 = vld [vmem:[#allocation8] sm:$0xff]  ;;  %v841_v8 = vld [vmem:[#allocation16 + $0x8] sm:$0xff]  ;;  %s1053_s20 = sshll.u32 %s1470_s10, 4  ;;  %s1054_s20 = int_to_ptr.vmem [resolvable:$true] %s1053_s20 }
  0xc5   :  { %1175 = vset.pattern.permute.xlu1 %v1469_v1  ;;  %197 = vmatprep.subr.mxu0 %v181_v2  ;;  %v343_v7 = vld [vmem:[#allocation11] sm:$0xff]  ;;  %v867_v9 = vld [vmem:[#allocation19 + $0x8] sm:$0xff]  ;;  %v341_v10 = vld [vmem:[#allocation10] sm:$0xff]  ;;  %s1418_s14 = scalar_lea.vmem %s1054_s20, 768  ;;  %p1423_p5 = scmp.lt.s32.totalorder %s1054_s20, %s1054_s20 }
  0xc6   :  { %1105 = vmatpush3.msra.mxu1 %v182_v3  ;;  %198 = vmatpush1.msra.mxu0 %v180_v4  ;;  %v344_v11 = vld [vmem:[#allocation11 + $0x8] sm:$0xff]  ;;  %v840_v12 = vld [vmem:[#allocation16] sm:$0xff]  ;;  %v342_v23 = vld [vmem:[#allocation10 + $0x8] sm:$0xff]  ;;  %p1419_p4 = scmp.ne.s32.totalorder %s1054_s20, %s1418_s14  ;;  %p1424_p6 = scmp.lt.s32.totalorder %s1418_s14, %s1418_s14 }
  0xc7   :  { %1107 = vmatmul.mubr.msk.f32.vlgmr.msra.gmra.mrb[0].mxu1 %vm193_vm1, %v186_v5  ;;  %1070 = vmatmul.mubr.msk.f32.vlgmr.msra.gmra.mrb[0].mxu0 %vm193_vm1, %v186_v5  ;;  %v866_v13 = vld [vmem:[#allocation19] sm:$0xff]  ;;  %v185_v26 = vld [vmem:[#allocation5 + $0x10] sm:$0xff]  ;;  %v521_v27 = vld [vmem:[#allocation14] sm:$0xff] }
  0xc8   :  { %190 = vperm.xlu0 %1174, %v187_v6   ;;  %425 = vmatprep.mubr.f32.mxu0 %v1467_v0  ;;  %v522_v28 = vld [vmem:[#allocation14 + $0x8] sm:$0xff]  ;;  %v184_v29 = vld [vmem:[#allocation5 + $0x8] sm:$0xff]  ;;  %v520_v51 = vld [vmem:[#allocation13 + $0x8] sm:$0xff]  ;;  %p1425_p7 = por %p1424_p6, %p1423_p5 }
  0xc9   :  { %1111 = vmatprep.mubr.msk.f32.mxu1 %vm193_vm1, %v341_v10  ;;  %352 = vperm.xlu1 %1175, %v344_v11   ;;  %v183_v30 = vld [vmem:[#allocation5] sm:$0xff]  ;;  %v519_v31 = vld [vmem:[#allocation13] sm:$0xff]  ;;  %v864_v56 = vld [vmem:[#allocation17] sm:$0xff] }
  0xca   :  { %v865_v6 = vld [vmem:[#allocation17 + $0x8] sm:$0xff]  ;;  %p1426_p8 = pnand %p1425_p7, %p1419_p4 }
  0xcc   :  { %347 = vperm.xlu0 %1174, %v343_v7  }
  0xcd   :  { %844 = vperm.xlu1 %1175, %v840_v12  }
  0xd0   :  { %849 = vperm.xlu0 %1174, %v841_v8  }
  0xd1   :  { %870 = vperm.xlu1 %1175, %v866_v13  }
  0xd4   :  { %875 = vperm.xlu0 %1174, %v867_v9  }
 0x147   :  { %v191_v14 = vpop.permute.xlu0 %190 }
 0x148   :  { %v353_v32 = vpop.permute.xlu1 %352 }
 0x14b   :  { %v348_v34 = vpop.permute.xlu0 %347 }
 0x14c   :  { %v845_v59 = vpop.permute.xlu1 %844 }
 0x14f   :  { %v850_v57 = vpop.permute.xlu0 %849 }
 0x19a   :  { %v334_v15 = vpop.f32.mrb[0].mxu1  ;;  %v263_v17 = vpop.f32.mrb[0].mxu0 }
 0x19b   :  { %v335_v16 = vadd.f32 %v334_v15, %v191_v14  ;;  %v1108_v18 = vpop.f32.mrb[1].mxu1  ;;  %v264_v19 = vadd.f32 %v263_v17, %v191_v14  ;;  %v265_v20 = vpop.f32.mrb[1].mxu0 }
 0x19c   :  { %v266_v22 = vadd.f32 %v265_v20, %v191_v14  ;;  %v876_v18 = vpop.permute.xlu0 %875  ;;  %v871_v20 = vpop.permute.xlu1 %870 }
 0x19d   :  { %v340_v21 = vmax.f32 %v335_v16, 0.0  ;;  %v338_v25 = vmax.f32 %v264_v19, 0.0 }
 0x19e   :  { %v339_v24 = vmax.f32 %v266_v22, 0.0 }
 0x19f   :  { %1109 = vmatprep.subr.mxu1 %v340_v21 }
 0x1a0   :  { %1110 = vmatpush3.msra.mxu1 %v340_v21  ;;  %361 = vmatprep.subr.mxu0 %v339_v24 }
 0x1a1   :  { %1112 = vmatmul.mubr.msk.f32.vlgmr.msra.gmra.mrb[2].mxu1 %vm193_vm1, %v342_v23  ;;  %362 = vmatpush1.msra.mxu0 %v338_v25 }
 0x1a2   :  { %593 = vmatprep.mubr.f32.mxu1 %v1467_v0  ;;  %1072 = vmatmul.mubr.msk.f32.vlgmr.msra.gmra.mrb[2].mxu0 %vm193_vm1, %v341_v10 }
 0x1a3   :  { %431 = vmatprep.mubr.f32.mxu0 %v1467_v0  ;;  %1114 = vmatprep.subr.mxu0 %v185_v26 }
 0x1a4   :  { %1115 = vmatpush3.msra.mxu0 %v185_v26  ;;  %529 = vmatprep.subr.mxu1 %v184_v29 }
 0x1a5   :  { %530 = vmatpush1.msra.mxu1 %v183_v30 }
 0x1a6   :  { %1073 = vmatmul.mubr.msk.f32.gmra.mrb[4].mxu0 %vm193_vm1, %v342_v23  ;;  %1076 = vmatmul.mubr.msk.f32.vlgmr.msra.gmra.mrb[4].mxu1 %vm193_vm1, %v521_v27 }
 0x1a7   :  { %1116 = vmatprep.mubr.msk.f32.mxu0 %vm193_vm1, %v521_v27  ;;  %599 = vmatprep.mubr.f32.mxu1 %v1467_v0 }
 0x1aa   :  { %1117 = vmatmul.mubr.msk.f32.vlgmr.msra.gmra.mrb[6].mxu0 %vm193_vm1, %v522_v28  ;;  %1077 = vmatmul.mubr.msk.f32.gmra.mrb[6].mxu1 %vm193_vm1, %v522_v28 }
 0x1ab   :  { %1123 = vmatprep.mubr.msk.f32.mxu0 %vm681_vm2, %v519_v31  ;;  %752 = vmatprep.mubr.f32.mxu1 %v1467_v0 }
 0x274   :  { %v1113_v33 = vpop.f32.mrb[2].mxu1 }
 0x275   :  { %v510_v35 = vadd.f32 %v1113_v33, %v353_v32  ;;  %v504_v36 = vpop.f32.mrb[3].mxu1  ;;  %v427_v38 = vpop.f32.mrb[2].mxu0 }
 0x276   :  { %v505_v37 = vadd.f32 %v504_v36, %v348_v34  ;;  %v429_v40 = vpop.f32.mrb[3].mxu0  ;;  %v428_v42 = vadd.f32 %v427_v38, %v348_v34 }
 0x277   :  { %v518_v39 = vmax.f32 %v510_v35, 0.0  ;;  %v430_v44 = vadd.f32 %v429_v40, %v348_v34 }
 0x278   :  { %v515_v41 = vmax.f32 %v505_v37, 0.0  ;;  %v513_v49 = vmax.f32 %v428_v42, 0.0 }
 0x279   :  { %v433_v45 = vpop.f32.mrb[4].mxu0  ;;  %v514_v52 = vmax.f32 %v430_v44, 0.0 }
 0x27a   :  { %v1137_v43 = vpack.c.bf16 %v518_v39, %v515_v41  ;;  %v434_v46 = vadd.f32 %v433_v45, %v353_v32  ;;  %v435_v47 = vpop.f32.mrb[5].mxu0 }
 0x27b   :  { %v436_v48 = vadd.f32 %v435_v47, %v353_v32 }
 0x27c   :  { %1138 = vmatprep.subr.bf16.mxu0 %v1137_v43  ;;  %v516_v50 = vmax.f32 %v434_v46, 0.0 }
 0x27d   :  { %1140 = vmatpush3.bf16.msra.mxu0 %v1137_v43  ;;  %v517_v53 = vmax.f32 %v436_v48, 0.0 }
 0x27e   :  { %v1135_v54 = vpack.c.bf16 %v516_v50, %v513_v49 }
 0x27f   :  { %v1133_v55 = vpack.c.bf16 %v517_v53, %v514_v52 }
 0x280   :  { %1124 = vmatmul.mubr.msk.f32.vlgmr.msra.gmra.mrb[6].mxu0 %vm681_vm2, %v520_v51 }
 0x281   :  { %948 = vmatprep.mubr.f32.mxu0 %v1467_v0  ;;  %1134 = vmatprep.subr.bf16.mxu1 %v1133_v55 }
 0x282   :  { %1136 = vmatpush1.bf16.msra.mxu1 %v1135_v54 }
 0x285   :  { %1080 = vmatmul.mubr.msk.f32.vlgmr.msra.gmra.mrb[4].mxu1 %vm681_vm2, %v519_v31 }
 0x286   :  { %758 = vmatprep.mubr.f32.mxu1 %v1467_v0 }
 0x289   :  { %1081 = vmatmul.mubr.msk.f32.gmra.mrb[6].mxu1 %vm681_vm2, %v520_v51 }
 0x28a   :  { %1130 = vmatprep.mubr.msk.f32.mxu1 %vm681_vm2, %v864_v56 }
 0x353   :  { %v1125_v58 = vpop.f32.mrb[6].mxu0 }
 0x354   :  { %v857_v60 = vadd.f32 %v1125_v58, %v850_v57  ;;  %v831_v61 = vpop.f32.mrb[7].mxu0 }
 0x355   :  { %v854_v62 = vadd.f32 %v845_v59, %v831_v61 }
 0x356   :  { %v863_v63 = vmax.f32 %v857_v60, 0.0 }
 0x357   :  { %v860_v1 = vmax.f32 %v854_v62, 0.0 }
 0x358   :  { %v754_v3 = vpop.f32.mrb[4].mxu1 }
 0x359   :  { %v1145_v2 = vpack.c.bf16 %v863_v63, %v860_v1  ;;  %v756_v4 = vpop.f32.mrb[5].mxu1  ;;  %v852_v5 = vadd.f32 %v845_v59, %v754_v3 }
 0x35a   :  { %v853_v7 = vadd.f32 %v845_v59, %v756_v4 }
 0x35b   :  { %1146 = vmatprep.subr.bf16.mxu1 %v1145_v2  ;;  %v858_v12 = vmax.f32 %v852_v5, 0.0 }
 0x35c   :  { %1148 = vmatpush3.bf16.msra.mxu1 %v1145_v2  ;;  %v760_v8 = vpop.f32.mrb[6].mxu1  ;;  %v859_v14 = vmax.f32 %v853_v7, 0.0 }
 0x35d   :  { %v855_v9 = vadd.f32 %v850_v57, %v760_v8  ;;  %v762_v10 = vpop.f32.mrb[7].mxu1 }
 0x35e   :  { %v856_v11 = vadd.f32 %v850_v57, %v762_v10 }
 0x35f   :  { %1131 = vmatmul.mubr.msk.f32.vlgmr.msra.gmra.mrb[8].mxu1 %vm681_vm2, %v865_v6  ;;  %v861_v13 = vmax.f32 %v855_v9, 0.0 }
 0x360   :  { %v862_v15 = vmax.f32 %v856_v11, 0.0 }
 0x361   :  { %v1143_v16 = vpack.c.bf16 %v861_v13, %v858_v12 }
 0x362   :  { %v1141_v17 = vpack.c.bf16 %v862_v15, %v859_v14 }
 0x364   :  { %1142 = vmatprep.subr.bf16.mxu0 %v1141_v17 }
 0x365   :  { %1144 = vmatpush1.bf16.msra.mxu0 %v1143_v16 }
 0x368   :  { %1084 = vmatmul.mubr.msk.f32.vlgmr.msra.gmra.mrb[8].mxu0 %vm681_vm2, %v864_v56 }
 0x369   :  { %954 = vmatprep.mubr.f32.mxu0 %v1467_v0 }
 0x36c   :  { %1085 = vmatmul.mubr.msk.f32.gmra.mrb[10].mxu0 %vm681_vm2, %v865_v6 }
 0x432   :  { %v1132_v19 = vpop.f32.mrb[8].mxu1 }
 0x433   :  { %v1033_v21 = vadd.f32 %v1132_v19, %v876_v18  ;;  %v1027_v22 = vpop.f32.mrb[9].mxu1 }
 0x434   :  { %v1028_v23 = vadd.f32 %v1027_v22, %v871_v20 }
 0x435   :  { %v1041_v24 = vmax.f32 %v1033_v21, 0.0 }
 0x436   :  { %v1038_v25 = vmax.f32 %v1028_v23, 0.0 }
 0x437   :  { %1047 = vst [vmem:[#allocation20 + $0x28] sm:$0xff] %v1041_v24 }
 0x438   :  { %1044 = vst [vmem:[#allocation20 + $0x10] sm:$0xff] %v1038_v25 }
 0x43b   :  { %v950_v26 = vpop.f32.mrb[8].mxu0 }
 0x43c   :  { %v951_v27 = vadd.f32 %v950_v26, %v871_v20  ;;  %v952_v28 = vpop.f32.mrb[9].mxu0 }
 0x43d   :  { %v953_v29 = vadd.f32 %v952_v28, %v871_v20 }
 0x43e   :  { %v1036_v30 = vmax.f32 %v951_v27, 0.0 }
 0x43f   :  { %v1037_v31 = vmax.f32 %v953_v29, 0.0  ;;  %v956_v32 = vpop.f32.mrb[10].mxu0 }
 0x440   :  { %1042 = vst [vmem:[#allocation20] sm:$0xff] %v1036_v30  ;;  %v957_v0 = vadd.f32 %v956_v32, %v876_v18  ;;  %v958_v33 = vpop.f32.mrb[11].mxu0 }
 0x441   :  { %1043 = vst [vmem:[#allocation20 + $0x8] sm:$0xff] %v1037_v31  ;;  %v959_v34 = vadd.f32 %v958_v33, %v876_v18 }
 0x442   :  { %v1039_v35 = vmax.f32 %v957_v0, 0.0 }
 0x443   :  { %v1040_v36 = vmax.f32 %v959_v34, 0.0 }
 0x444   :  { %1045 = vst [vmem:[#allocation20 + $0x18] sm:$0xff] %v1039_v35 }
 0x445   :  { %1046 = vst [vmem:[#allocation20 + $0x20] sm:$0xff] %v1040_v36 }
 0x446   :  { %1429 = shalt.err (!%p1426_p8)
}
 0x447   :  { %s1430_s4 = scalar_lea.hbm %s1759_s11, 768 }
 0x448   :  { %p1431_p9 = scmp.ne.s32.totalorder %s1759_s11, %s1430_s4  ;;  %p1434_p10 = scmp.lt.u32.totalorder %s1430_s4, %s1759_s11 }
 0x44a   :  { %p1436_p11 = pnand %p1434_p10, %p1431_p9 }
 0x44c   :  { %1439 = shalt.err (!%p1436_p11)
}
 0x44d   :  { %s1471_s22 = smov 384   ;;  %s1472_s24 = smov 24  }
 0x44e   :  { %1059 = dma.vmem_to_hbm [thread:$0]  %s1054_s20, 768, %s1759_s11, [#allocation4], %s1471_s22, %s1471_s22, %s1472_s24  }
 0x44f   :  { %1452 = dma.done.wait [#allocation4], 768  }
 0x450   :  { %1453 = vsyncadd [#allocation4], 4294966528 }
 0x451   :  { %1063 = vsyncpa [#allocation3], 1 }
 0x452   :  { %1064 = vsyncpa [#allocation6], 1 }
 0x453   :  { %1065 = vsyncpa [#allocation9], 1 }
 0x454   :  { %1066 = vsyncpa [#allocation12], 1 }
 0x455   :  { %1067 = vsyncpa [#allocation15], 1 }
 0x456   :  { %1068 = vsyncpa [#allocation18], 1 }
 0x457   :  { %1069 = vsyncpa [#allocation4], 1 }

</bundles_post_ra>
